<compile_context>
chip_gen: v7x
topology: tpu7x:2x2x1
jax: 0.10.0
libtpu: 0.0.40
codegen_flags: <defaults>
</compile_context>

<pallas_src>
import jax
import jax.numpy as jnp
from jax.experimental import pallas as pl
from jax.experimental.pallas import tpu as pltpu

BN_EPS = 1e-5
MiB = 1024 * 1024


def _round_up(x, m):
    return ((x + m - 1) // m) * m


def _vmem_capacity_bytes():
    try:
        return int(pltpu.get_tpu_info().vmem_capacity_bytes)
    except Exception:
        return 64 * MiB  # conservative default (v7x per-TensorCore VMEM)


def _pad2(a, rows, cols):
    pr, pc = rows - a.shape[0], cols - a.shape[1]
    if pr == 0 and pc == 0:
        return a
    return jnp.pad(a, ((0, pr), (0, pc)))


# ----------------------------- kernels --------------------------------------

def _resident_kernel(x_ref, w1_ref, b1_ref, w2_ref, b2_ref, out_ref):
    # add_block: Linear with BN folded into (w1, b1); Dropout == identity (eval).
    x = x_ref[...].astype(jnp.bfloat16)                       # VPU cast of loaded tile
    h = jnp.dot(x, w1_ref[...], preferred_element_type=jnp.float32) + b1_ref[...]
    # classifier: Linear(num_bottleneck -> class_num), whole class dim resident.
    out = jnp.dot(h.astype(jnp.bfloat16), w2_ref[...],
                  preferred_element_type=jnp.float32) + b2_ref[...]
    out_ref[...] = out.astype(out_ref.dtype)


def _tiled_kernel(x_ref, w1_ref, b1_ref, w2_ref, b2_ref, out_ref, h_ref):
    # Fallback for very large class counts (w2 not VMEM-resident).
    # Invariant: class axis (grid axis 1) must stay "arbitrary" and innermost,
    # because h_ref is written at j == 0 and reused for j > 0.
    @pl.when(pl.program_id(1) == 0)
    def _():
        x = x_ref[...].astype(jnp.bfloat16)
        h = jnp.dot(x, w1_ref[...], preferred_element_type=jnp.float32) + b1_ref[...]
        h_ref[...] = h.astype(h_ref.dtype)

    out = jnp.dot(h_ref[...], w2_ref[...],
                  preferred_element_type=jnp.float32) + b2_ref[...]
    out_ref[...] = out.astype(out_ref.dtype)


# ----------------------------- wrapper ---------------------------------------

def class_block_forward(x, params, out_dtype=jnp.float32):
    """Eval-mode ClassBlock forward. x: [B, input_dim] -> [B, class_num]."""
    B, D = x.shape
    Nb = params["w1"].shape[1]
    C = params["w2"].shape[1]

    # ---- Fold eval-mode BatchNorm1d into the first Linear (one-time, f32). ----
    scale = params["gamma"] * jax.lax.rsqrt(params["running_var"] + BN_EPS)   # [1, Nb]
    w1f = params["w1"] * scale                                                # [D, Nb]
    b1f = (params["b1"] - params["running_mean"]) * scale + params["beta"]    # [1, Nb]

    nb_pad = _round_up(Nb, 128)
    c_pad = _round_up(C, 128)     # never overshoots past the next 128 multiple

    x_item = jnp.dtype(x.dtype).itemsize
    out_item = jnp.dtype(out_dtype).itemsize

    # ---- Generation-aware VMEM budget / tile caps. ----
    vmem_cap = _vmem_capacity_bytes()
    big_vmem = vmem_cap >= 120 * MiB                       # v5e / v6e (128 MiB)
    vmem_ceiling = 100 * MiB if big_vmem else max(32 * MiB, vmem_cap - 8 * MiB)
    tm_max = 512 if big_vmem else 256

    # ---- Batch tile: aim for >= 2 tiles (v7x megacore) when the batch allows. ----
    if B <= 8:
        tm = 8
    elif B <= tm_max:
        tm = _round_up((B + 1) // 2, 8)
    else:
        tm = tm_max

    # ---- Honest VMEM estimates (constant-index operands still get 2 buffers). ----
    def resident_bytes(tm_):
        return (2 * tm_ * D * x_item              # x tile (double-buffered)
                + 2 * D * nb_pad * 2              # w1 bf16 (constant map, 2 bufs)
                + 2 * nb_pad * 4                  # b1 f32
                + 2 * nb_pad * c_pad * 2          # w2 bf16 (resident)
                + 2 * c_pad * 4                   # b2 f32
                + 2 * tm_ * c_pad * out_item      # out tile (double-buffered)
                + tm_ * nb_pad * (4 + 2))         # h f32 + bf16 temporaries

    def tiled_bytes(tm_, tn_):
        return (2 * tm_ * D * x_item
                + 2 * D * nb_pad * 2
                + 2 * nb_pad * 4
                + 3 * nb_pad * tn_ * 2            # w2 tile, Buffered(3)
                + 2 * tn_ * 4
                + 2 * tm_ * tn_ * out_item
                + tm_ * nb_pad * (4 + 2))         # h scratch + f32 temporary

    use_resident = resident_bytes(tm) <= vmem_ceiling

    if use_resident:
        est = resident_bytes(tm)
        tn = c_pad
    else:
        # Largest class tile in {512,384,256,128} that divides c_pad exactly
        # -> zero over-padded class columns.
        tn = next(t for t in (512, 384, 256, 128) if c_pad % t == 0)
        while tiled_bytes(tm, tn) > vmem_ceiling and tm > 16:
            tm = _round_up(tm // 2, 8)
        est = tiled_bytes(tm, tn)

    vmem_limit = int(min(vmem_ceiling, max(32 * MiB, int(1.25 * est))))

    # ---- Pad only what is needed (no D padding, no wrapper-side x recast). ----
    b_pad = _round_up(B, tm)
    x_in = x if b_pad == B else jnp.pad(x, ((0, b_pad - B), (0, 0)))
    w1_p = _pad2(w1f.astype(jnp.bfloat16), D, nb_pad)
    b1_p = _pad2(b1f, 1, nb_pad)
    w2_p = _pad2(params["w2"].astype(jnp.bfloat16), nb_pad, c_pad)
    b2_p = _pad2(params["b2"], 1, c_pad)

    if use_resident:
        out_pad = pl.pallas_call(
            _resident_kernel,
            out_shape=jax.ShapeDtypeStruct((b_pad, c_pad), out_dtype),
            grid_spec=pltpu.PrefetchScalarGridSpec(
                num_scalar_prefetch=0,
                grid=(b_pad // tm,),
                in_specs=[
                    pl.BlockSpec((tm, D), lambda i: (i, 0)),          # x (streamed)
                    pl.BlockSpec((D, nb_pad), lambda i: (0, 0)),      # w1 (resident)
                    pl.BlockSpec((1, nb_pad), lambda i: (0, 0)),      # b1 (resident)
                    pl.BlockSpec((nb_pad, c_pad), lambda i: (0, 0)),  # w2 (resident)
                    pl.BlockSpec((1, c_pad), lambda i: (0, 0)),       # b2 (resident)
                ],
                out_specs=pl.BlockSpec((tm, c_pad), lambda i: (i, 0)),
            ),
            compiler_params=pltpu.CompilerParams(
                dimension_semantics=("parallel",),
                vmem_limit_bytes=vmem_limit,
            ),
        )(x_in, w1_p, b1_p, w2_p, b2_p)
    else:
        out_pad = pl.pallas_call(
            _tiled_kernel,
            out_shape=jax.ShapeDtypeStruct((b_pad, c_pad), out_dtype),
            grid_spec=pltpu.PrefetchScalarGridSpec(
                num_scalar_prefetch=0,
                grid=(b_pad // tm, c_pad // tn),
                in_specs=[
                    pl.BlockSpec((tm, D), lambda i, j: (i, 0)),       # x
                    pl.BlockSpec((D, nb_pad), lambda i, j: (0, 0)),   # w1 (resident)
                    pl.BlockSpec((1, nb_pad), lambda i, j: (0, 0)),   # b1 (resident)
                    pl.BlockSpec((nb_pad, tn), lambda i, j: (0, j),
                                 pipeline_mode=pl.Buffered(3)),       # w2 (streamed)
                    pl.BlockSpec((1, tn), lambda i, j: (0, j)),       # b2 (streamed)
                ],
                out_specs=pl.BlockSpec((tm, tn), lambda i, j: (i, j)),
                scratch_shapes=[pltpu.VMEM((tm, nb_pad), jnp.bfloat16)],
            ),
            compiler_params=pltpu.CompilerParams(
                dimension_semantics=("parallel", "arbitrary"),
                vmem_limit_bytes=vmem_limit,
            ),
        )(x_in, w1_p, b1_p, w2_p, b2_p)

    return out_pad[:B, :C]


# ----------------------------- init + references -----------------------------

def init_params(key, input_dim, num_bottleneck, class_num):
    k1, k2, k3 = jax.random.split(key, 3)
    # add_block Linear: kaiming_normal_(a=0, mode='fan_out') -> std = sqrt(2/out)
    w1 = (jax.random.normal(k1, (input_dim, num_bottleneck), jnp.float32)
          * jnp.sqrt(2.0 / num_bottleneck))
    b1 = jnp.zeros((1, num_bottleneck), jnp.float32)
    # BatchNorm1d: gamma ~ N(1, 0.02), beta = 0, running stats at defaults.
    gamma = 1.0 + 0.02 * jax.random.normal(k2, (1, num_bottleneck), jnp.float32)
    beta = jnp.zeros((1, num_bottleneck), jnp.float32)
    running_mean = jnp.zeros((1, num_bottleneck), jnp.float32)
    running_var = jnp.ones((1, num_bottleneck), jnp.float32)
    # classifier Linear: normal std=0.001, bias 0.
    w2 = 0.001 * jax.random.normal(k3, (num_bottleneck, class_num), jnp.float32)
    b2 = jnp.zeros((1, class_num), jnp.float32)
    return dict(w1=w1, b1=b1, gamma=gamma, beta=beta,
                running_mean=running_mean, running_var=running_var,
                w2=w2, b2=b2)


def reference_forward_f32(x, p):
    h = x @ p["w1"] + p["b1"]
    h = (h - p["running_mean"]) / jnp.sqrt(p["running_var"] + BN_EPS)
    h = h * p["gamma"] + p["beta"]
    return h @ p["w2"] + p["b2"]


def reference_forward_bf16(x, p):
    # Mirrors the kernel's precision choices: bf16 operands, f32 accumulation.
    scale = p["gamma"] * jax.lax.rsqrt(p["running_var"] + BN_EPS)
    w1f = (p["w1"] * scale).astype(jnp.bfloat16)
    b1f = (p["b1"] - p["running_mean"]) * scale + p["beta"]
    h = jnp.dot(x.astype(jnp.bfloat16), w1f,
                preferred_element_type=jnp.float32) + b1f
    h = h.astype(jnp.bfloat16)
    return jnp.dot(h, p["w2"].astype(jnp.bfloat16),
                   preferred_element_type=jnp.float32) + p["b2"]


if __name__ == "__main__":
    key = jax.random.PRNGKey(0)
    kx, kp = jax.random.split(key)

    # Small, deliberately non-aligned shapes (ragged batch, Nb and C not
    # multiples of 128) to exercise padding and the ragged-batch-tile path.
    # Production heads (D=2048, Nb=512, C up to thousands) use the same
    # resident-weights code path.
    B, input_dim, num_bottleneck, class_num = 10, 48, 96, 23
    x = jax.random.normal(kx, (B, input_dim), jnp.float32)
    params = init_params(kp, input_dim, num_bottleneck, class_num)

    fwd = jax.jit(class_block_forward)
    out = jax.block_until_ready(fwd(x, params))
    assert out.shape == (B, class_num)

    # Tight check against a precision-matched (bf16 operand / f32 accum) reference.
    ref_bf16 = reference_forward_bf16(x, params)
    assert jnp.allclose(out, ref_bf16, atol=1e-4, rtol=1e-3), \
        "mismatch vs bf16-precision reference"

    # Looser check against the pure-f32 reference (bf16 operand rounding).
    ref_f32 = reference_forward_f32(x, params)
    assert jnp.allclose(out, ref_f32, atol=5e-4, rtol=5e-2), \
        "mismatch vs f32 reference"

    print("KERNEL_OK")
</pallas_src>

<mosaic_0001>
module attributes {stable_mosaic.version = 11 : i64} {
  func.func @_resident_kernel(%arg0: i32, %arg1: memref<8x48xf32, #tpu.memory_space<vmem>>, %arg2: memref<48x128xbf16, #tpu.memory_space<vmem>>, %arg3: memref<1x128xf32, #tpu.memory_space<vmem>>, %arg4: memref<128x128xbf16, #tpu.memory_space<vmem>>, %arg5: memref<1x128xf32, #tpu.memory_space<vmem>>, %arg6: memref<8x128xf32, #tpu.memory_space<vmem>>) attributes {dimension_semantics = [#tpu.dimension_semantics<parallel>], iteration_bounds = array<i64: 2>, scalar_prefetch = 0 : i64, scratch_operands = 0 : i64, tpu.core_type = #tpu.core_type<tc>, window_params = [{transform_indices = @transform_0, window_bounds = array<i64: 8, 48>}, {pipeline_mode = #tpu.pipeline_mode<synchronous>, transform_indices = @transform_1, window_bounds = array<i64: 48, 128>}, {pipeline_mode = #tpu.pipeline_mode<synchronous>, transform_indices = @transform_2, window_bounds = array<i64: 1, 128>}, {pipeline_mode = #tpu.pipeline_mode<synchronous>, transform_indices = @transform_3, window_bounds = array<i64: 128, 128>}, {pipeline_mode = #tpu.pipeline_mode<synchronous>, transform_indices = @transform_4, window_bounds = array<i64: 1, 128>}, {transform_indices = @transform_5, window_bounds = array<i64: 8, 128>}]} {
    %c0 = arith.constant 0 : index
    %c0_0 = arith.constant 0 : index
    %0 = vector.load %arg1[%c0, %c0_0] : memref<8x48xf32, #tpu.memory_space<vmem>>, vector<8x48xf32>
    %1 = arith.truncf %0 : vector<8x48xf32> to vector<8x48xbf16>
    %c0_1 = arith.constant 0 : index
    %c0_2 = arith.constant 0 : index
    %2 = vector.load %arg2[%c0_1, %c0_2] : memref<48x128xbf16, #tpu.memory_space<vmem>>, vector<48x128xbf16>
    %cst = arith.constant dense<0.000000e+00> : vector<8x128xf32>
    %3 = tpu.matmul %1, %2, %cst {dimension_numbers = #tpu.dot_dimension_numbers<[1], [0], [0], [1], [0, 0, 1, 1], [], []>} : vector<8x48xbf16>, vector<48x128xbf16>, vector<8x128xf32> -> vector<8x128xf32>
    %c0_3 = arith.constant 0 : index
    %c0_4 = arith.constant 0 : index
    %4 = vector.load %arg3[%c0_3, %c0_4] : memref<1x128xf32, #tpu.memory_space<vmem>>, vector<1x128xf32>
    %5 = vector.broadcast %4 : vector<1x128xf32> to vector<8x128xf32>
    %6 = arith.addf %3, %5 : vector<8x128xf32>
    %7 = arith.truncf %6 : vector<8x128xf32> to vector<8x128xbf16>
    %c0_5 = arith.constant 0 : index
    %c0_6 = arith.constant 0 : index
    %8 = vector.load %arg4[%c0_5, %c0_6] : memref<128x128xbf16, #tpu.memory_space<vmem>>, vector<128x128xbf16>
    %cst_7 = arith.constant dense<0.000000e+00> : vector<8x128xf32>
    %9 = tpu.matmul %7, %8, %cst_7 {dimension_numbers = #tpu.dot_dimension_numbers<[1], [0], [0], [1], [0, 0, 1, 1], [], []>} : vector<8x128xbf16>, vector<128x128xbf16>, vector<8x128xf32> -> vector<8x128xf32>
    %c0_8 = arith.constant 0 : index
    %c0_9 = arith.constant 0 : index
    %10 = vector.load %arg5[%c0_8, %c0_9] : memref<1x128xf32, #tpu.memory_space<vmem>>, vector<1x128xf32>
    %11 = vector.broadcast %10 : vector<1x128xf32> to vector<8x128xf32>
    %12 = arith.addf %9, %11 : vector<8x128xf32>
    %c0_10 = arith.constant 0 : index
    %c0_11 = arith.constant 0 : index
    %13 = vector.load %arg6[%c0_10, %c0_11] : memref<8x128xf32, #tpu.memory_space<vmem>>, vector<8x128xf32>
    tpu.vector_store %arg6[%c0_10, %c0_11], %12 {strides = array<i32>} : memref<8x128xf32, #tpu.memory_space<vmem>>, vector<8x128xf32>,
    return
  }
  func.func @transform_0(%arg0: i32) -> (i32, i32) {
    %c0_i32 = arith.constant 0 : i32
    %c0_i32_0 = arith.constant 0 : i32
    return %arg0, %c0_i32 : i32, i32
  }
  func.func @transform_1(%arg0: i32) -> (i32, i32) {
    %c0_i32 = arith.constant 0 : i32
    %c0_i32_0 = arith.constant 0 : i32
    %c0_i32_1 = arith.constant 0 : i32
    return %c0_i32, %c0_i32_0 : i32, i32
  }
  func.func @transform_2(%arg0: i32) -> (i32, i32) {
    %c0_i32 = arith.constant 0 : i32
    %c0_i32_0 = arith.constant 0 : i32
    %c0_i32_1 = arith.constant 0 : i32
    return %c0_i32, %c0_i32_0 : i32, i32
  }
  func.func @transform_3(%arg0: i32) -> (i32, i32) {
    %c0_i32 = arith.constant 0 : i32
    %c0_i32_0 = arith.constant 0 : i32
    %c0_i32_1 = arith.constant 0 : i32
    return %c0_i32, %c0_i32_0 : i32, i32
  }
  func.func @transform_4(%arg0: i32) -> (i32, i32) {
    %c0_i32 = arith.constant 0 : i32
    %c0_i32_0 = arith.constant 0 : i32
    %c0_i32_1 = arith.constant 0 : i32
    return %c0_i32, %c0_i32_0 : i32, i32
  }
  func.func @transform_5(%arg0: i32) -> (i32, i32) {
    %c0_i32 = arith.constant 0 : i32
    %c0_i32_0 = arith.constant 0 : i32
    return %arg0, %c0_i32 : i32, i32
  }
}

</mosaic_0001>

<bundles_post_ra>
// kernel: class_block_forward.1
= control target key start
LH: loop header
LB: loop body
LE: loop exit
PB: predicated region body
PF: predicated region fallthrough
CT: control target
= control target key end

     0   :  { %10 = vsyncpa [#allocation3], 0  ;;  %s839_s0 = inlined_call_operand.vmem [shape: f32[16,48], index: 0, kind: input, shape index: {}]   ;;  %s840_s1 = inlined_call_operand.vmem [shape: bf16[48,128], index: 1, kind: input, shape index: {}]   ;;  %s841_s2 = inlined_call_operand.vmem [shape: f32[1,128], index: 2, kind: input, shape index: {}]   ;;  %s842_s3 = inlined_call_operand.vmem [shape: bf16[128,128], index: 3, kind: input, shape index: {}]   ;;  %s843_s4 = inlined_call_operand.vmem [shape: f32[1,128], index: 4, kind: input, shape index: {}]   ;;  %s844_s5 = inlined_call_operand.hbm [shape: f32[16,128], index: 5, kind: output, shape index: {}]  }
   0x1   :  { %12 = vsyncpa [#allocation3 + $0x1], 0  ;;  %s700_s18 = smov 0   ;;  %s702_s19 = smov 0  }
   0x2   :  { %s704_s20 = smov 0   ;;  %s706_s21 = smov 0  }
   0x3 LB: > { %s721_s22 = sadd.s32 4294967295, %s665_s21   ;;  %s484_s23 = sadd.s32 4294967294, %s665_s21   ;;  %s665_s21 = sphi %s706_s21, %s850_s21   ;;  %s661_s20 = sphi %s704_s20, %s849_s20   ;;  %s657_s19 = sphi %s702_s19, %s848_s19   ;;  %s653_s18 = sphi %s700_s18, %s847_s18  }
   0x4   : > { %s725_s24 = sadd.s32 1, %s665_s21   ;;  %s135_s25 = sadd.s32 1, %s661_s20 }
   0x5   : > { %s132_s26 = ssub.s32 %s665_s21, %s725_s24  ;;  %p145_p0 = scmp.ne.s32.totalorder %s661_s20, %s657_s19 }
   0x6   : > { %p133_p1 = scmp.eq.s32.totalorder %s132_s26, 0  ;;  %p146_p2 = scmp.eq.s32.totalorder %s721_s22, 1 }
   0x7   : > { %p151_p3 = scmp.ne.s32.totalorder %s657_s19, %s653_s18  ;;  %p152_p4 = scmp.eq.s32.totalorder %s484_s23, 1 }
   0x8   : > { %s736_s27 = scalar_select %p133_p1, %s661_s20, %s135_s25  }
   0x9   : > { %p738_p5 = por %p146_p2, %p145_p0  ;;  %p742_p6 = por %p152_p4, %p151_p3 }
   0xa   : > { %p487_p7 = scmp.ge.s32.totalorder %s665_s21, 1  ;;  %p189_p8 = scmp.lt.s32.totalorder %s665_s21, 3 }
   0xc   : > { %p190_p9 = pnand %p487_p7, %p189_p8 }
   0xd   : > { %v592_v0 = vld [vmem:[%s840_s1] sm:$0xff] (!%p190_p9)   ;;  %v667_v1 = vmov (!%p190_p9), 0.0   ;;  %v593_v2 = vld [vmem:[%s840_s1 + $0x8] sm:$0xff] (!%p190_p9)   ;;  %vm668_vm0 = vmmov (!%p190_p9), 0   ;;  %p216_p10 = scmp.lt.s32.totalorder (!%p190_p9), %s721_s22, 1  ;;  %v594_v5 = vld [vmem:[%s840_s1 + $0x10] sm:$0xff] (!%p190_p9)  }
   0xe   : > { %193 = sbr.rel (%p190_p9) target bundleno = 472 (0x1d8), region = 40  ;;  %521 = vmatprep.subr.bf16.mxu0 (!%p190_p9), %v667_v1  ;;  %531 = vmatprep.subr.bf16.mxu1 (!%p190_p9), %v667_v1  ;;  %v595_v3 = vld [vmem:[%s842_s3] sm:$0xff] (!%p190_p9)   ;;  %v596_v4 = vld [vmem:[%s842_s3 + $0x8] sm:$0xff] (!%p190_p9)   ;;  %v597_v8 = vld [vmem:[%s842_s3 + $0x10] sm:$0xff] (!%p190_p9)   ;;  %vm254_vm1 = vcmask (!%p190_p9), 392192   ;;  %s213_s23 = sand.u32 (!%p190_p9), 1, %s657_s19  }
   0xf   : > { %522 = vmatpush3.bf16.msra.mxu0 (!%p190_p9), %v592_v0  ;;  %527 = vmatprep.mubr.msk.bf16.mxu0 (!%p190_p9), %vm668_vm0, %v667_v1  ;;  %v598_v9 = vld [vmem:[%s842_s3 + $0x18] sm:$0xff] (!%p190_p9)   ;;  %v599_v10 = vld [vmem:[%s842_s3 + $0x20] sm:$0xff] (!%p190_p9)   ;;  %v600_v11 = vld [vmem:[%s842_s3 + $0x28] sm:$0xff] (!%p190_p9)   ;;  %s505_s6 = sshll.u32 (!%p190_p9), %s721_s22, 7  ;;  %s412_s12 = scalar_lea.sflag (!%p190_p9), [#allocation3], %s213_s23 }
  0x10   : > { %523 = vmatprep.subr.bf16.mxu0 (!%p190_p9), %v667_v1  ;;  %547 = vmatprep.mubr.msk.bf16.mxu1 (!%p190_p9), %vm668_vm0, %v667_v1  ;;  %v601_v12 = vld [vmem:[%s842_s3 + $0x30] sm:$0xff] (!%p190_p9)   ;;  %v602_v13 = vld [vmem:[%s842_s3 + $0x38] sm:$0xff] (!%p190_p9)   ;;  %v490_v14 = vld [vmem:[%s841_s2] ss:$0 sm:$0xff] (!%p190_p9)  ;;  %s669_s13 = smov (!%p190_p9), [#allocation2]  }
  0x11   : > { %532 = vmatpush3.bf16.msra.mxu1 (!%p190_p9), %v595_v3  ;;  %v495_v21 = vld [vmem:[%s843_s4] ss:$0 sm:$0xff] (!%p190_p9)  ;;  %s607_s14 = sshll.u32 (!%p190_p9), %s669_s13, 4  ;;  %s608_s14 = int_to_ptr.vmem [resolvable:$false] %s607_s14 }
  0x12   : > { %533 = vmatprep.subr.bf16.mxu1 (!%p190_p9), %v667_v1  ;;  %s609_s15 = scalar_lea.vmem (!%p190_p9), %s608_s14, 256 }
  0x13   : > { %524 = vmatpush3.bf16.msra.mxu0 (!%p190_p9), %v593_v2 }
  0x14   : > { %525 = vmatprep.subr.bf16.mxu0 (!%p190_p9), %v667_v1 }
  0x15   : > { %s217_s11 = scalar_select %p216_p10, %s721_s22, 1  ;;  %534 = vmatpush3.bf16.msra.mxu1 %v596_v4 }
  0x16   : > { %535 = vmatprep.subr.bf16.mxu1 %v667_v1 }
  0x17   : > { %s489_s16 = sshll.u32 %s217_s11, 3  ;;  %526 = vmatpush3.bf16.msra.mxu0 %v594_v5  ;;  %s797_s11 = scalar_lea.hbm %s844_s5, %s505_s6 }
  0x18   : > { %s219_s25 = scalar_lea.vmem %s839_s0, %s489_s16 }
  0x19   : > { %v221_v6 = vld [vmem:[%s219_s25] sm:$0xff]  ;;  %536 = vmatpush3.bf16.msra.mxu1 %v597_v8  ;;  %s488_s25 = sshll.u32 %s213_s23, 3 }
  0x1a   : > { %v222_v7 = vpack.c.bf16 %v221_v6, %v221_v6  ;;  %537 = vmatprep.subr.bf16.mxu1 %v667_v1  ;;  %s215_s7 = scalar_lea.vmem [#allocation2], %s488_s25 }
  0x1b   : > { %s425_s8 = sshll.u32 %s215_s7, 4  ;;  %s799_s8 = int_to_ptr.vmem [resolvable:$true] %s425_s8 }
  0x1c   : > { %528 = vmatmul.mubr.msk.bf16.vlgmr.msra.gmra.mrb[0].mxu0 %vm254_vm1, %v222_v7  ;;  %s603_s22 = scalar_lea.vmem %s799_s8, 128  ;;  %p610_p0 = scmp.lt.s32.totalorder %s799_s8, %s608_s14 }
  0x1d   : > { %538 = vmatpush3.bf16.msra.mxu1 %v598_v9  ;;  %p604_p11 = scmp.ne.s32.totalorder %s799_s8, %s603_s22  ;;  %p611_p1 = scmp.lt.s32.totalorder %s609_s15, %s603_s22 }
  0x1e   : > { %539 = vmatprep.subr.bf16.mxu1 %v667_v1 }
  0x1f   : > { %p605_p12 = pnand %p604_p11, %p738_p5  ;;  %p612_p2 = por %p611_p1, %p610_p0 }
  0x21   : > { %540 = vmatpush3.bf16.msra.mxu1 %v599_v10  ;;  %p606_p13 = pneg %p605_p12 }
  0x22   : > { %541 = vmatprep.subr.bf16.mxu1 %v667_v1 }
  0x23   : > { %p613_p3 = pnand %p612_p2, %p606_p13 }
  0x25   : > { %542 = vmatpush3.bf16.msra.mxu1 %v600_v11 }
  0x26   : > { %543 = vmatprep.subr.bf16.mxu1 %v667_v1 }
  0x29   : > { %544 = vmatpush3.bf16.msra.mxu1 %v601_v12 }
  0x2a   : > { %545 = vmatprep.subr.bf16.mxu1 %v667_v1 }
  0x2d   : > { %546 = vmatpush3.bf16.msra.mxu1 %v602_v13 }
  0xef   : > { %v292_v15 = vpop.f32.mrb[0].mxu0 }
  0xf0   : > { %v293_v16 = vadd.f32 %v490_v14, %v292_v15  ;;  %v529_v17 = vpop.f32.mrb[1].mxu0 }
  0xf1   : > { %v295_v18 = vpop.f32.mrb[2].mxu0 }
  0xf2   : > { %v298_v19 = vpack.c.bf16 %v293_v16, %v293_v16  ;;  %v530_v20 = vpop.f32.mrb[3].mxu0 }
  0xf4   : > { %548 = vmatmul.mubr.bf16.vlgmr.msra.gmra.mrb[0].mxu1 %v298_v19 }
 0x1c7   : > { %v404_v22 = vpop.f32.mrb[0].mxu1 }
 0x1c8   : > { %v405_v23 = vadd.f32 %v495_v21, %v404_v22  ;;  %v549_v24 = vpop.f32.mrb[1].mxu1 }
 0x1c9   : > { %v407_v25 = vpop.f32.mrb[2].mxu1 }
 0x1ca   : > { %410 = vst [vmem:[%s215_s7] sm:$0xff] %v405_v23  ;;  %v550_v26 = vpop.f32.mrb[3].mxu1 }
 0x1cb   : > { %616 = shalt.err (!%p613_p3)
}
 0x1cc   : > { %s617_s16 = scalar_lea.hbm %s797_s11, 128  ;;  %s621_s25 = scalar_lea.hbm %s844_s5, 256 }
 0x1cd   : > { %p618_p4 = scmp.ne.s32.totalorder %s797_s11, %s617_s16  ;;  %p622_p9 = scmp.lt.u32.totalorder %s797_s11, %s844_s5 }
 0x1ce   : > { %p623_p10 = scmp.lt.u32.totalorder %s621_s25, %s617_s16  ;;  %p625_p12 = scmp.lt.u32.totalorder %s617_s16, %s797_s11 }
 0x1cf   : > { %p619_p7 = pnand %p618_p4, %p738_p5 }
 0x1d0   : > { %p624_p11 = por %p623_p10, %p622_p9 }
 0x1d1   : > { %p620_p8 = pneg %p619_p7 }
 0x1d2   : > { %p626_p13 = por %p625_p12, %p624_p11 }
 0x1d4   : > { %p627_p0 = pnand %p626_p13, %p620_p8 }
 0x1d6   : > { %630 = shalt.err (!%p627_p0)
}
 0x1d7   : > { %551 = dma.vmem_to_hbm [thread:$0]  (%p738_p5), %s799_s8, 128, %s797_s11, %s412_s12  }
 0x1d8 PF: > { %p557_p1 = scmp.ge.s32.totalorder %s665_s21, 2  ;;  %s437_s6 = sand.u32 1, %s653_s18  }
 0x1d9   : > { %s438_s7 = scalar_lea.sflag [#allocation3], %s437_s6 }
 0x1da   : > { %p554_p2 = pnand %p557_p1, %p742_p6 }
 0x1dc   : > { %648 = dma.done.wait (!%p554_p2), %s438_s7, 128  }
 0x1dd   : > { %650 = vsyncadd (!%p554_p2), %s438_s7, 4294967168  ;;  %p15_p3 = scmp.ge.s32.totalorder %s725_s24, 4   ;;  %s847_s18 = smov %s657_s19 }
 0x1de   : > { %s848_s19 = smov %s661_s20  ;;  %s849_s20 = smov %s736_s27 }
 0x1df   : > { %s850_s21 = smov %s725_s24  ;;  %17 = sbr.rel (!%p15_p3) target bundleno = 3 (0x3), region = 75 }
 0x1e6   :  { %443 = vsyncpa [#allocation3], 1 }
 0x1e7   :  { %445 = vsyncpa [#allocation3 + $0x1], 1 }

</bundles_post_ra>
